<compile_context>
chip_gen: v7x
topology: tpu7x:2x2x1
jax: 0.10.0
libtpu: 0.0.40
codegen_flags: <defaults>
</compile_context>

<pallas_src>
import jax
import jax.numpy as jnp
from jax.experimental import pallas as pl
from jax.experimental.pallas import tpu as pltpu

_EPS = 1e-8
_MAX_BLOCK_ROWS = 1024   # (1024, 512) f32 = 2 MiB per ref per buffer
_TARGET_STEPS = 8        # aim for >= ~8 grid steps so the pipeline fills


def _gaussian_kl_kernel(u1_ref, s1_ref, u2_ref, s2_ref, o_ref):
    u1 = u1_ref[...]
    s1 = s1_ref[...]
    u2 = u2_ref[...]
    s2 = s2_ref[...]
    diff = u1 - u2
    # log(s2+eps) - log(s1+eps) - 0.5 + 0.5/s2^2 * (s1^2 + (u1-u2)^2)
    log_term = jnp.log(s2 + _EPS) - jnp.log(s1 + _EPS)
    inv_s2_sq = pl.reciprocal(s2 * s2, approx=False)  # exact: stays inside 1e-5 rtol
    o_ref[...] = log_term - 0.5 + 0.5 * inv_s2_sq * (s1 * s1 + diff * diff)


def _gaussian_kl_jnp(u1, s1, u2, s2):
    # Plain-JAX fallback for the (<128-element) unaligned tail.
    return (jnp.log(s2 + _EPS) - jnp.log(s1 + _EPS) - 0.5
            + 0.5 / (s2 * s2) * (s1 * s1 + (u1 - u2) * (u1 - u2)))


def _pick_block_rows(rows):
    if rows <= 8:
        return rows  # single full-dim block; input is tiny (< 4 KiB/stream)
    # Multiple of 8, >= 8, <= _MAX_BLOCK_ROWS, aiming for >= _TARGET_STEPS steps.
    return min(_MAX_BLOCK_ROWS, max(8, (rows // _TARGET_STEPS) & ~7))


def gaussian_kl(u1, s1, u2, s2):
    """Elementwise Gaussian KL (supports scalar args via broadcasting)."""
    u1, s1, u2, s2 = jnp.broadcast_arrays(
        jnp.asarray(u1), jnp.asarray(s1), jnp.asarray(u2), jnp.asarray(s2))
    orig_shape = u1.shape
    out_dtype = jnp.result_type(u1.dtype, s1.dtype, u2.dtype, s2.dtype)
    if not jnp.issubdtype(out_dtype, jnp.floating):
        out_dtype = jnp.float32

    n = int(u1.size)
    if n == 0:
        return jnp.zeros(orig_shape, out_dtype)

    flats = [jnp.asarray(x, jnp.float32).reshape(-1) for x in (u1, s1, u2, s2)]

    # Lane-dense layout without padding: pick the widest lane count dividing n.
    if n < 128:
        lanes, n_main = n, n             # single (1, n) block == full dims (legal)
    elif n % 512 == 0:
        lanes, n_main = 512, n
    elif n % 256 == 0:
        lanes, n_main = 256, n
    elif n % 128 == 0:
        lanes, n_main = 128, n
    else:
        lanes = 128
        n_main = (n // 128) * 128        # aligned prefix in-kernel, tail in jnp
    n_tail = n - n_main

    rows = n_main // lanes
    block_rows = _pick_block_rows(rows)
    grid = (pl.cdiv(rows, block_rows),)  # ragged last block: Pallas masks OOB stores

    blk = pl.BlockSpec((block_rows, lanes), lambda i: (i, 0))
    mains = [x[:n_main].reshape(rows, lanes) for x in flats]

    cost = pl.CostEstimate(
        flops=12 * n_main,
        transcendentals=2 * n_main,
        bytes_accessed=5 * 4 * n_main,
    )

    out_main = pl.pallas_call(
        _gaussian_kl_kernel,
        out_shape=jax.ShapeDtypeStruct((rows, lanes), jnp.float32),
        grid_spec=pltpu.PrefetchScalarGridSpec(
            num_scalar_prefetch=0,
            grid=grid,
            in_specs=[blk, blk, blk, blk],
            out_specs=blk,
        ),
        compiler_params=pltpu.CompilerParams(
            # "parallel" lets the grid axis shard across v7x's 2 TensorCores.
            dimension_semantics=("parallel",),
            # Explicit limit: 20 MiB double-buffered footprint at the largest
            # tile; 48 MiB is within v7x's 64 MiB and v5e/v6e's 128 MiB VMEM.
            vmem_limit_bytes=48 << 20,
        ),
        cost_estimate=cost,
    )(*mains)

    out_flat = out_main.reshape(-1)
    if n_tail > 0:
        tail = _gaussian_kl_jnp(*(x[n_main:] for x in flats))
        out_flat = jnp.concatenate([out_flat, tail])

    return out_flat.reshape(orig_shape).astype(out_dtype)


if __name__ == "__main__":
    key = jax.random.PRNGKey(0)
    k1, k2, k3, k4 = jax.random.split(key, 4)

    def ref_kl(u1, s1, u2, s2):
        # Mirrors the PyTorch formula exactly.
        return (jnp.log((s2 + _EPS) / (s1 + _EPS)) - 0.5
                + 0.5 / jnp.power(s2, 2)
                * (jnp.power(s1, 2) + jnp.power(u1 - u2, 2)))

    # Primary test: small NCHW shape, as in the module's typical use.
    shape = (2, 4, 16, 16)
    u1 = jax.random.normal(k1, shape, dtype=jnp.float32)
    u2 = jax.random.normal(k2, shape, dtype=jnp.float32)
    s1 = jax.random.uniform(k3, shape, dtype=jnp.float32, minval=0.5, maxval=2.0)
    s2 = jax.random.uniform(k4, shape, dtype=jnp.float32, minval=0.5, maxval=2.0)

    out = jax.block_until_ready(gaussian_kl(u1, s1, u2, s2))
    ref = ref_kl(u1, s1, u2, s2)
    assert out.shape == shape and out.dtype == jnp.float32
    assert jnp.allclose(out, ref, rtol=1e-5, atol=1e-5), "mismatch vs reference (aligned)"

    # Secondary test: non-128-multiple flat size -> multi-step grid with a
    # ragged last block plus a plain-jnp tail.
    n2 = 70000
    kk = jax.random.split(jax.random.PRNGKey(1), 4)
    u1b = jax.random.normal(kk[0], (n2,), dtype=jnp.float32)
    u2b = jax.random.normal(kk[1], (n2,), dtype=jnp.float32)
    s1b = jax.random.uniform(kk[2], (n2,), dtype=jnp.float32, minval=0.5, maxval=2.0)
    s2b = jax.random.uniform(kk[3], (n2,), dtype=jnp.float32, minval=0.5, maxval=2.0)
    outb = jax.block_until_ready(gaussian_kl(u1b, s1b, u2b, s2b))
    refb = ref_kl(u1b, s1b, u2b, s2b)
    assert jnp.allclose(outb, refb, rtol=1e-5, atol=1e-5), "mismatch vs reference (ragged)"

    print("KERNEL_OK")
</pallas_src>

<mosaic_0001>
module attributes {stable_mosaic.version = 11 : i64} {
  func.func @_gaussian_kl_kernel(%arg0: i32, %arg1: memref<4x512xf32, #tpu.memory_space<vmem>>, %arg2: memref<4x512xf32, #tpu.memory_space<vmem>>, %arg3: memref<4x512xf32, #tpu.memory_space<vmem>>, %arg4: memref<4x512xf32, #tpu.memory_space<vmem>>, %arg5: memref<4x512xf32, #tpu.memory_space<vmem>>) attributes {dimension_semantics = [#tpu.dimension_semantics<parallel>], iteration_bounds = array<i64: 1>, scalar_prefetch = 0 : i64, scratch_operands = 0 : i64, tpu.core_type = #tpu.core_type<tc>, window_params = [{transform_indices = @transform_0, window_bounds = array<i64: 4, 512>}, {transform_indices = @transform_1, window_bounds = array<i64: 4, 512>}, {transform_indices = @transform_2, window_bounds = array<i64: 4, 512>}, {transform_indices = @transform_3, window_bounds = array<i64: 4, 512>}, {transform_indices = @transform_4, window_bounds = array<i64: 4, 512>}]} {
    %c0 = arith.constant 0 : index
    %c0_0 = arith.constant 0 : index
    %0 = vector.load %arg1[%c0, %c0_0] : memref<4x512xf32, #tpu.memory_space<vmem>>, vector<4x512xf32>
    %c0_1 = arith.constant 0 : index
    %c0_2 = arith.constant 0 : index
    %1 = vector.load %arg2[%c0_1, %c0_2] : memref<4x512xf32, #tpu.memory_space<vmem>>, vector<4x512xf32>
    %c0_3 = arith.constant 0 : index
    %c0_4 = arith.constant 0 : index
    %2 = vector.load %arg3[%c0_3, %c0_4] : memref<4x512xf32, #tpu.memory_space<vmem>>, vector<4x512xf32>
    %c0_5 = arith.constant 0 : index
    %c0_6 = arith.constant 0 : index
    %3 = vector.load %arg4[%c0_5, %c0_6] : memref<4x512xf32, #tpu.memory_space<vmem>>, vector<4x512xf32>
    %4 = arith.subf %0, %2 : vector<4x512xf32>
    %cst = arith.constant 9.99999993E-9 : f32
    %5 = vector.broadcast %cst : f32 to vector<4x512xf32>
    %6 = arith.addf %3, %5 : vector<4x512xf32>
    %7 = math.log %6 : vector<4x512xf32>
    %cst_7 = arith.constant 9.99999993E-9 : f32
    %8 = vector.broadcast %cst_7 : f32 to vector<4x512xf32>
    %9 = arith.addf %1, %8 : vector<4x512xf32>
    %10 = math.log %9 : vector<4x512xf32>
    %11 = arith.subf %7, %10 : vector<4x512xf32>
    %12 = arith.mulf %3, %3 : vector<4x512xf32>
    %13 = tpu.reciprocal %12 : vector<4x512xf32> -> vector<4x512xf32>
    %cst_8 = arith.constant 5.000000e-01 : f32
    %14 = vector.broadcast %cst_8 : f32 to vector<4x512xf32>
    %15 = arith.subf %11, %14 : vector<4x512xf32>
    %cst_9 = arith.constant 5.000000e-01 : f32
    %16 = vector.broadcast %cst_9 : f32 to vector<4x512xf32>
    %17 = arith.mulf %16, %13 : vector<4x512xf32>
    %18 = arith.mulf %1, %1 : vector<4x512xf32>
    %19 = arith.mulf %4, %4 : vector<4x512xf32>
    %20 = arith.addf %18, %19 : vector<4x512xf32>
    %21 = arith.mulf %17, %20 : vector<4x512xf32>
    %22 = arith.addf %15, %21 : vector<4x512xf32>
    %c0_10 = arith.constant 0 : index
    %c0_11 = arith.constant 0 : index
    %23 = vector.load %arg5[%c0_10, %c0_11] : memref<4x512xf32, #tpu.memory_space<vmem>>, vector<4x512xf32>
    tpu.vector_store %arg5[%c0_10, %c0_11], %22 {strides = array<i32>} : memref<4x512xf32, #tpu.memory_space<vmem>>, vector<4x512xf32>,
    return
  }
  func.func @transform_0(%arg0: i32) -> (i32, i32) {
    %c0_i32 = arith.constant 0 : i32
    %c0_i32_0 = arith.constant 0 : i32
    return %arg0, %c0_i32 : i32, i32
  }
  func.func @transform_1(%arg0: i32) -> (i32, i32) {
    %c0_i32 = arith.constant 0 : i32
    %c0_i32_0 = arith.constant 0 : i32
    return %arg0, %c0_i32 : i32, i32
  }
  func.func @transform_2(%arg0: i32) -> (i32, i32) {
    %c0_i32 = arith.constant 0 : i32
    %c0_i32_0 = arith.constant 0 : i32
    return %arg0, %c0_i32 : i32, i32
  }
  func.func @transform_3(%arg0: i32) -> (i32, i32) {
    %c0_i32 = arith.constant 0 : i32
    %c0_i32_0 = arith.constant 0 : i32
    return %arg0, %c0_i32 : i32, i32
  }
  func.func @transform_4(%arg0: i32) -> (i32, i32) {
    %c0_i32 = arith.constant 0 : i32
    %c0_i32_0 = arith.constant 0 : i32
    return %arg0, %c0_i32 : i32, i32
  }
}

</mosaic_0001>

<bundles_post_ra>
// kernel: tpu_custom_call.1
= control target key start
LH: loop header
LB: loop body
LE: loop exit
PB: predicated region body
PF: predicated region fallthrough
CT: control target
= control target key end

     0   :  { %9 = vsyncpa [#allocation3], 0  ;;  %s353_s0 = inlined_call_operand.hbm [shape: f32[4,512], index: 0, kind: input, shape index: {}]   ;;  %s354_s1 = inlined_call_operand.hbm [shape: f32[4,512], index: 1, kind: input, shape index: {}]   ;;  %s355_s2 = inlined_call_operand.hbm [shape: f32[4,512], index: 2, kind: input, shape index: {}]   ;;  %s356_s3 = inlined_call_operand.hbm [shape: f32[4,512], index: 3, kind: input, shape index: {}]   ;;  %s357_s4 = inlined_call_operand.hbm [shape: f32[4,512], index: 4, kind: output, shape index: {}]  }
   0x1   :  { %10 = vsyncpa [#allocation6], 0 }
   0x2   :  { %11 = vsyncpa [#allocation9], 0 }
   0x3   :  { %12 = vsyncpa [#allocation4], 0  ;;  %s263_s15 = smov [#allocation5]   ;;  %s264_s17 = smov [#allocation2]  }
   0x4   :  { %s29_s16 = sshll.u32 %s263_s15, 4  ;;  %s19_s18 = sshll.u32 %s264_s17, 4  ;;  %s30_s16 = int_to_ptr.vmem [resolvable:$true] %s29_s16  ;;  %s20_s18 = int_to_ptr.vmem [resolvable:$true] %s19_s18 }
   0x5   :  { %s145_s21 = scalar_lea.hbm %s354_s1, 256 }
   0x6   :  { %p146_p0 = scmp.ne.s32.totalorder %s354_s1, %s145_s21  ;;  %p149_p1 = scmp.lt.u32.totalorder %s145_s21, %s354_s1 }
   0x8   :  { %p151_p2 = pnand %p149_p1, %p146_p0 }
   0xa   :  { %154 = shalt.err (!%p151_p2)
}
   0xb   :  { %s155_s26 = scalar_lea.vmem %s30_s16, 256  ;;  %p160_p4 = scmp.lt.s32.totalorder %s30_s16, %s30_s16 }
   0xc   :  { %p156_p3 = scmp.ne.s32.totalorder %s30_s16, %s155_s26  ;;  %p161_p5 = scmp.lt.s32.totalorder %s155_s26, %s155_s26 }
   0xe   :  { %p162_p6 = por %p161_p5, %p160_p4 }
  0x10   :  { %p163_p7 = pnand %p162_p6, %p156_p3 }
  0x12   :  { %166 = shalt.err (!%p163_p7)
}
  0x13   :  { %32 = dma.hbm_to_vmem [thread:$0]  %s354_s1, 256, %s30_s16, [#allocation6]  }
  0x14   :  { %s167_s5 = scalar_lea.hbm %s353_s0, 256 }
  0x15   :  { %p168_p8 = scmp.ne.s32.totalorder %s353_s0, %s167_s5  ;;  %p171_p9 = scmp.lt.u32.totalorder %s167_s5, %s353_s0 }
  0x17   :  { %p173_p10 = pnand %p171_p9, %p168_p8 }
  0x19   :  { %176 = shalt.err (!%p173_p10)
}
  0x1a   :  { %s177_s10 = scalar_lea.vmem %s20_s18, 256  ;;  %p182_p12 = scmp.lt.s32.totalorder %s20_s18, %s20_s18 }
  0x1b   :  { %p178_p11 = scmp.ne.s32.totalorder %s20_s18, %s177_s10  ;;  %p183_p13 = scmp.lt.s32.totalorder %s177_s10, %s177_s10 }
  0x1d   :  { %p184_p0 = por %p183_p13, %p182_p12 }
  0x1f   :  { %p185_p1 = pnand %p184_p0, %p178_p11 }
  0x21   :  { %188 = shalt.err (!%p185_p1)
}
  0x22   :  { %22 = dma.hbm_to_vmem [thread:$0]  %s353_s0, 256, %s20_s18, [#allocation3]  }
  0x23   :  { %s265_s12 = smov [#allocation7]   ;;  %s266_s14 = smov [#allocation8]  }
  0x24   :  { %s39_s13 = sshll.u32 %s265_s12, 4  ;;  %s49_s15 = sshll.u32 %s266_s14, 4  ;;  %s40_s13 = int_to_ptr.vmem [resolvable:$true] %s39_s13  ;;  %s50_s15 = int_to_ptr.vmem [resolvable:$true] %s49_s15 }
  0x25   :  { %s189_s19 = scalar_lea.hbm %s355_s2, 256 }
  0x26   :  { %p190_p2 = scmp.ne.s32.totalorder %s355_s2, %s189_s19  ;;  %p193_p3 = scmp.lt.u32.totalorder %s189_s19, %s355_s2 }
  0x28   :  { %p195_p4 = pnand %p193_p3, %p190_p2 }
  0x2a   :  { %198 = shalt.err (!%p195_p4)
}
  0x2b   :  { %s199_s0 = scalar_lea.vmem %s40_s13, 256  ;;  %p204_p6 = scmp.lt.s32.totalorder %s40_s13, %s40_s13 }
  0x2c   :  { %p200_p5 = scmp.ne.s32.totalorder %s40_s13, %s199_s0  ;;  %p205_p7 = scmp.lt.s32.totalorder %s199_s0, %s199_s0 }
  0x2e   :  { %p206_p8 = por %p205_p7, %p204_p6 }
  0x30   :  { %p207_p9 = pnand %p206_p8, %p200_p5 }
  0x32   :  { %210 = shalt.err (!%p207_p9)
}
  0x33   :  { %42 = dma.hbm_to_vmem [thread:$0]  %s355_s2, 256, %s40_s13, [#allocation6]  }
  0x34   :  { %s211_s27 = scalar_lea.hbm %s356_s3, 256 }
  0x35   :  { %p212_p10 = scmp.ne.s32.totalorder %s356_s3, %s211_s27  ;;  %p215_p11 = scmp.lt.u32.totalorder %s211_s27, %s356_s3 }
  0x37   :  { %p217_p12 = pnand %p215_p11, %p212_p10 }
  0x39   :  { %220 = shalt.err (!%p217_p12)
}
  0x3a   :  { %s221_s6 = scalar_lea.vmem %s50_s15, 256  ;;  %p226_p0 = scmp.lt.s32.totalorder %s50_s15, %s50_s15 }
  0x3b   :  { %p222_p13 = scmp.ne.s32.totalorder %s50_s15, %s221_s6  ;;  %p227_p1 = scmp.lt.s32.totalorder %s221_s6, %s221_s6 }
  0x3d   :  { %p228_p2 = por %p227_p1, %p226_p0 }
  0x3f   :  { %p229_p3 = pnand %p228_p2, %p222_p13 }
  0x41   :  { %232 = shalt.err (!%p229_p3)
}
  0x42   :  { %52 = dma.hbm_to_vmem [thread:$0]  %s356_s3, 256, %s50_s15, [#allocation9]  }
  0x43   :  { %255 = dma.done.wait [#allocation3], 256  }
  0x44   :  { %256 = vsyncadd [#allocation3], 4294967040 }
  0x45   :  { %257 = dma.done.wait [#allocation6], 512  }
  0x46   :  { %258 = vsyncadd [#allocation6], 4294966784 }
  0x47   :  { %259 = dma.done.wait [#allocation9], 256  }
  0x48   :  { %260 = vsyncadd [#allocation9], 4294967040  ;;  %v67_v0 = vld [vmem:[#allocation5] sm:$0xff]  ;;  %v68_v3 = vld [vmem:[#allocation5 + $0x8] sm:$0xff]  ;;  %s267_s3 = smov [#allocation10]  }
  0x49   :  { %v71_v1 = vld [vmem:[#allocation8] sm:$0xff]  ;;  %v81_v2 = vadd.f32 1e-08, %v67_v0  ;;  %v72_v6 = vld [vmem:[#allocation8 + $0x8] sm:$0xff]  ;;  %v65_v7 = vld [vmem:[#allocation2] sm:$0xff]  ;;  %v97_v16 = vmul.f32 %v67_v0, %v67_v0  ;;  %v98_v19 = vmul.f32 %v68_v3, %v68_v3  ;;  %s115_s8 = sshll.u32 %s267_s3, 4  ;;  %s116_s8 = int_to_ptr.vmem [resolvable:$true] %s115_s8 }
  0x4a   :  { %v75_v4 = vadd.f32 1e-08, %v71_v1  ;;  %v89_v5 = vmul.f32 %v71_v1, %v71_v1  ;;  %v69_v8 = vld [vmem:[#allocation7] sm:$0xff]  ;;  %v76_v9 = vadd.f32 1e-08, %v72_v6  ;;  %v90_v11 = vmul.f32 %v72_v6, %v72_v6  ;;  %v66_v13 = vld [vmem:[#allocation2 + $0x8] sm:$0xff]  ;;  %p238_p5 = scmp.lt.s32.totalorder %s116_s8, %s116_s8 }
  0x4b   :  { %133 = vlog2.f32 %v81_v2  ;;  %v82_v10 = vadd.f32 1e-08, %v68_v3  ;;  %v73_v12 = vsub.f32 %v65_v7, %v69_v8  ;;  %v70_v14 = vld [vmem:[#allocation7 + $0x8] sm:$0xff]  ;;  %s233_s9 = scalar_lea.vmem %s116_s8, 256 }
  0x4c   :  { %135 = vlog2.f32 %v75_v4  ;;  %v74_v15 = vsub.f32 %v66_v13, %v70_v14  ;;  %p234_p4 = scmp.ne.s32.totalorder %s116_s8, %s233_s9  ;;  %p239_p6 = scmp.lt.s32.totalorder %s233_s9, %s233_s9 }
  0x4d   :  { %137 = vrcp.f32 %v89_v5  ;;  %v99_v17 = vmul.f32 %v73_v12, %v73_v12 }
  0x4e   :  { %139 = vlog2.f32 %v76_v9  ;;  %v100_v20 = vmul.f32 %v74_v15, %v74_v15  ;;  %p240_p7 = por %p239_p6, %p238_p5 }
  0x4f   :  { %141 = vlog2.f32 %v82_v10  ;;  %v101_v23 = vadd.f32 %v99_v17, %v97_v16 }
  0x50   :  { %143 = vrcp.f32 %v90_v11  ;;  %v102_v31 = vadd.f32 %v100_v20, %v98_v19  ;;  %p241_p8 = pnand %p240_p7, %p234_p4 }
  0x55   :  { %v134_v18 = vpop.eup %133 }
  0x56   :  { %v136_v21 = vpop.eup %135  ;;  %v84_v22 = vmul.f32 0.6931472, %v134_v18 }
  0x57   :  { %v138_v24 = vpop.eup %137  ;;  %v78_v25 = vmul.f32 0.6931472, %v136_v21 }
  0x58   :  { %v140_v26 = vpop.eup %139  ;;  %v95_v27 = vmul.f32 0.5, %v138_v24 }
  0x59   :  { %v142_v28 = vpop.eup %141  ;;  %v87_v29 = vsub.f32 %v78_v25, %v84_v22  ;;  %v80_v30 = vmul.f32 0.6931472, %v140_v26 }
  0x5a   :  { %v144_v32 = vpop.eup %143  ;;  %v103_v33 = vmul.f32 %v101_v23, %v95_v27  ;;  %v86_v34 = vmul.f32 0.6931472, %v142_v28 }
  0x5b   :  { %v126_v35 = vadd.f32 -0.5, %v87_v29  ;;  %v96_v36 = vmul.f32 0.5, %v144_v32 }
  0x5c   :  { %v88_v37 = vsub.f32 %v80_v30, %v86_v34 }
  0x5d   :  { %v105_v38 = vadd.f32 %v126_v35, %v103_v33  ;;  %v104_v39 = vmul.f32 %v102_v31, %v96_v36 }
  0x5e   :  { %v127_v40 = vadd.f32 -0.5, %v88_v37 }
  0x5f   :  { %107 = vst [vmem:[#allocation10] sm:$0xff] %v105_v38 }
  0x60   :  { %v106_v41 = vadd.f32 %v127_v40, %v104_v39 }
  0x62   :  { %108 = vst [vmem:[#allocation10 + $0x8] sm:$0xff] %v106_v41 }
  0x63   :  { %244 = shalt.err (!%p241_p8)
}
  0x64   :  { %s245_s11 = scalar_lea.hbm %s357_s4, 256 }
  0x65   :  { %p246_p9 = scmp.ne.s32.totalorder %s357_s4, %s245_s11  ;;  %p249_p10 = scmp.lt.u32.totalorder %s245_s11, %s357_s4 }
  0x67   :  { %p251_p11 = pnand %p249_p10, %p246_p9 }
  0x69   :  { %254 = shalt.err (!%p251_p11)
}
  0x6a   :  { %118 = dma.vmem_to_hbm [thread:$0]  %s116_s8, 256, %s357_s4, [#allocation4]  }
  0x6b   :  { %261 = dma.done.wait [#allocation4], 256  }
  0x6c   :  { %262 = vsyncadd [#allocation4], 4294967040 }
  0x6d   :  { %122 = vsyncpa [#allocation3], 1 }
  0x6e   :  { %123 = vsyncpa [#allocation6], 1 }
  0x6f   :  { %124 = vsyncpa [#allocation9], 1 }
  0x70   :  { %125 = vsyncpa [#allocation4], 1 }

</bundles_post_ra>
